<compile_context>
chip_gen: v6e
topology: v6e:2x2x1
jax: 0.10.0
libtpu: 0.0.40
codegen_flags: <defaults>
</compile_context>

<pallas_src>
import functools

import jax
import jax.numpy as jnp
from jax import lax
from jax.experimental import pallas as pl
from jax.experimental.pallas import tpu as pltpu


def mycnn_kernel(tok_ref, embt_ref, wc_ref, bc_ref, wo_ref, bo_ref, o_ref):
    # tok_ref : (1, TBB) int32   token ids, time-major (lane r = t*BB + b)
    # embt_ref: (H1, V)          embedding table, transposed, VMEM resident
    # wc_ref  : (H2, 3*H1)       conv weight (reshaped only, no transpose)
    # bc_ref  : (H2, 1)          conv bias
    # wo_ref  : (O, H2)          output weight (as-is)
    # bo_ref  : (O, 1)           output bias
    # o_ref   : (O, BB)          per-block output, lane-dense
    tbb = tok_ref.shape[1]
    bb = o_ref.shape[1]
    t_len = tbb // bb
    h1, v = embt_ref.shape
    dot_dtype = wc_ref.dtype

    # --- embedding gather as a one-hot matmul (MXU), lane-dense on TBB.
    # NOTE: out-of-range token ids produce an all-zero embedding row (no one-hot
    # match) instead of erroring like nn.Embedding; inputs are assumed in-range.
    # TODO(synk): for large vocabularies (2*V*H1*dtype beyond ~32-48 MiB — v7x
    # has only 64 MiB VMEM and the block is double-buffered) switch the table to
    # memory_space=pl.ANY + a DMA row gather instead of a VMEM-resident table.
    tok = tok_ref[...]                                            # (1, TBB)
    vocab_iota = lax.broadcasted_iota(jnp.int32, (v, tbb), 0)     # (V, TBB)
    onehot = (tok == vocab_iota).astype(dot_dtype)                # (V, TBB)
    e = jnp.dot(embt_ref[...], onehot,
                preferred_element_type=jnp.float32)               # (H1, TBB) f32

    # --- Conv1d(kernel=3*H1, stride=H1, padding=H1) == ONE K=3*H1 matmul over
    # an im2col tile. Time shift of +/-1 == lane roll by +/-BB (XLU), with the
    # t==0 / t==T-1 columns masked to the zero padding.
    col = lax.broadcasted_iota(jnp.int32, (h1, tbb), 1)
    e_prev = jnp.where(col >= bb, pltpu.roll(e, bb, axis=1), 0.0)            # e[t-1]
    e_next = jnp.where(col < tbb - bb, pltpu.roll(e, tbb - bb, axis=1), 0.0)  # e[t+1]
    x = jnp.concatenate([e_prev, e, e_next], axis=0).astype(dot_dtype)       # (3H1,TBB)

    acc = jnp.dot(wc_ref[...], x, preferred_element_type=jnp.float32)        # (H2,TBB)
    act = jnp.tanh(acc + bc_ref[...].astype(jnp.float32))                    # (H2,TBB)

    # --- max over time. Lane r = t*BB + b, so reduce lane groups of stride BB.
    if (t_len & (t_len - 1)) == 0:
        # log2(T)-step roll tree: fold the upper half of time onto the lower half.
        hmax = act
        span = tbb
        while span > bb:
            half = span // 2
            hmax = jnp.maximum(hmax, pltpu.roll(hmax, tbb - half, axis=1))
            span = half
        hmax = hmax[:, 0:bb]                                                 # (H2, BB)
    else:
        hmax = act[:, 0:bb]
        for t in range(1, t_len):                                            # static unroll
            hmax = jnp.maximum(hmax, act[:, t * bb:(t + 1) * bb])

    # --- output projection, lane-dense (O, BB) store.
    out = (jnp.dot(wo_ref[...], hmax.astype(dot_dtype),
                   preferred_element_type=jnp.float32)
           + bo_ref[...].astype(jnp.float32))
    o_ref[...] = out.astype(o_ref.dtype)


def prepare_params(embed_w, conv_w, conv_b, out_w, out_b,
                   dot_dtype=jnp.float32):
    """One-time weight layout prep for the transposed dataflow.

    dot_dtype=jnp.bfloat16 enables the full-rate MXU mode on v6e/v7x (f32
    accumulation is kept inside the kernel); jnp.float32 keeps exact parity.
    Biases stay f32 either way.
    """
    h2, _, k = conv_w.shape
    h1 = k // 3
    o = out_w.shape[0]
    emb_t = jnp.transpose(embed_w).astype(dot_dtype)     # (H1, V)
    wc = conv_w.reshape(h2, 3 * h1).astype(dot_dtype)    # (H2, 3*H1)
    bc = conv_b.reshape(h2, 1).astype(jnp.float32)       # (H2, 1)
    wo = out_w.astype(dot_dtype)                         # (O, H2)
    bo = out_b.reshape(o, 1).astype(jnp.float32)         # (O, 1)
    return emb_t, wc, bc, wo, bo


@functools.partial(jax.jit, static_argnames=("block_b",))
def mycnn_forward(tokens, emb_t, wc, bc, wo, bo, *, block_b=128):
    """tokens: (B, T) int32 -> (B, O) float32.

    Each row of `tokens` is an independent sequence run through the original
    MyCNN forward (embed -> conv -> tanh -> max-over-time -> linear).
    """
    b, t = tokens.shape
    h1, v = emb_t.shape
    h2 = wc.shape[0]
    o = wo.shape[0]
    if b % block_b != 0:
        raise ValueError("batch must be a multiple of block_b")
    nb = b // block_b
    tbb = t * block_b

    # Time-major, lane-dense token layout: lane r = t*block_b + b_in_block.
    tok = tokens.reshape(nb, block_b, t).transpose(0, 2, 1)       # (nb, T, BB)
    tok = tok.reshape(nb, 1, tbb).astype(jnp.int32)               # (nb, 1, TBB)

    out = pl.pallas_call(
        mycnn_kernel,
        out_shape=jax.ShapeDtypeStruct((nb, o, block_b), jnp.float32),
        grid_spec=pltpu.PrefetchScalarGridSpec(
            num_scalar_prefetch=0,
            grid=(nb,),
            in_specs=[
                pl.BlockSpec((None, 1, tbb), lambda i: (i, 0, 0)),   # tokens
                pl.BlockSpec((h1, v), lambda i: (0, 0)),             # emb^T
                pl.BlockSpec((h2, 3 * h1), lambda i: (0, 0)),         # conv W
                pl.BlockSpec((h2, 1), lambda i: (0, 0)),              # conv b
                pl.BlockSpec((o, h2), lambda i: (0, 0)),              # out W
                pl.BlockSpec((o, 1), lambda i: (0, 0)),               # out b
            ],
            out_specs=pl.BlockSpec((None, o, block_b), lambda i: (i, 0, 0)),
        ),
        compiler_params=pltpu.CompilerParams(
            dimension_semantics=("parallel",)),
    )(tok, emb_t, wc, bc, wo, bo)
    # (nb, O, BB) -> (B, O)
    return out.transpose(0, 2, 1).reshape(b, o)


def mycnn_reference_single(tokens, embed_w, conv_w, conv_b, out_w, out_b):
    """Pure-JAX reference mirroring the PyTorch forward for one sequence."""
    t = tokens.shape[0]
    h2, _, k = conv_w.shape
    h1 = k // 3
    e = jnp.take(embed_w, tokens, axis=0)                       # (T, H1)
    e_pad = jnp.pad(e, ((1, 1), (0, 0)))                        # (T+2, H1)
    x = jnp.concatenate(
        [e_pad[0:t], e_pad[1:t + 1], e_pad[2:t + 2]], axis=1)   # (T, 3*H1)
    hh = jnp.tanh(x @ conv_w.reshape(h2, 3 * h1).T + conv_b)    # (T, H2)
    hmax = jnp.max(hh, axis=0)                                  # (H2,)
    return hmax @ out_w.T + out_b                               # (O,)


if __name__ == "__main__":
    # small, deterministic config (matches the module's shape relations)
    input_size = 32      # vocab
    hidden_size1 = 16    # embedding dim
    hidden_size2 = 8     # conv out channels
    output_size = 4
    seq_len = 8
    batch = 256          # independent sequences per kernel call
    block_b = 128        # sequences per grid step -> TBB = 1024 lanes, grid=(2,)

    key = jax.random.PRNGKey(0)
    k_tok, k_emb, k_cw, k_cb, k_ow, k_ob = jax.random.split(key, 6)

    tokens = jax.random.randint(
        k_tok, (batch, seq_len), 0, input_size, dtype=jnp.int32)
    embed_w = jax.random.normal(
        k_emb, (input_size, hidden_size1), jnp.float32) * 0.1
    conv_w = jax.random.normal(
        k_cw, (hidden_size2, 1, 3 * hidden_size1), jnp.float32) * 0.1
    conv_b = jax.random.normal(k_cb, (hidden_size2,), jnp.float32) * 0.1
    out_w = jax.random.normal(
        k_ow, (output_size, hidden_size2), jnp.float32) * 0.1
    out_b = jax.random.normal(k_ob, (output_size,), jnp.float32) * 0.1

    y_ref = jax.vmap(
        lambda tk: mycnn_reference_single(
            tk, embed_w, conv_w, conv_b, out_w, out_b))(tokens)

    # --- f32 operand path: parity with the PyTorch module
    params_f32 = prepare_params(
        embed_w, conv_w, conv_b, out_w, out_b, dot_dtype=jnp.float32)
    y = mycnn_forward(tokens, *params_f32, block_b=block_b)
    jax.block_until_ready(y)
    assert y.shape == (batch, output_size)
    err = float(jnp.max(jnp.abs(y - y_ref)))
    assert jnp.allclose(y, y_ref, atol=1e-4, rtol=1e-4), (
        "f32 max abs err = %e" % err)

    # --- bf16 MXU-operand path (v6e/v7x full-rate mode), f32 accumulation
    params_bf16 = prepare_params(
        embed_w, conv_w, conv_b, out_w, out_b, dot_dtype=jnp.bfloat16)
    y_bf16 = mycnn_forward(tokens, *params_bf16, block_b=block_b)
    jax.block_until_ready(y_bf16)
    err_bf16 = float(jnp.max(jnp.abs(y_bf16 - y_ref)))
    assert err_bf16 < 3e-2, "bf16 max abs err = %e" % err_bf16

    print("KERNEL_OK")
</pallas_src>

<mosaic_0001>
module attributes {stable_mosaic.version = 11 : i64} {
  func.func @mycnn_kernel(%arg0: i32, %arg1: memref<1x1x1024xi32, #tpu.memory_space<vmem>>, %arg2: memref<16x32xf32, #tpu.memory_space<vmem>>, %arg3: memref<8x48xf32, #tpu.memory_space<vmem>>, %arg4: memref<8x1xf32, #tpu.memory_space<vmem>>, %arg5: memref<4x8xf32, #tpu.memory_space<vmem>>, %arg6: memref<4x1xf32, #tpu.memory_space<vmem>>, %arg7: memref<1x4x128xf32, #tpu.memory_space<vmem>>) attributes {dimension_semantics = [#tpu.dimension_semantics<parallel>], iteration_bounds = array<i64: 2>, scalar_prefetch = 0 : i64, scratch_operands = 0 : i64, tpu.core_type = #tpu.core_type<tc>, window_params = [{transform_indices = @transform_0, window_bounds = array<i64: 1, 1, 1024>}, {pipeline_mode = #tpu.pipeline_mode<synchronous>, transform_indices = @transform_1, window_bounds = array<i64: 16, 32>}, {pipeline_mode = #tpu.pipeline_mode<synchronous>, transform_indices = @transform_2, window_bounds = array<i64: 8, 48>}, {pipeline_mode = #tpu.pipeline_mode<synchronous>, transform_indices = @transform_3, window_bounds = array<i64: 8, 1>}, {pipeline_mode = #tpu.pipeline_mode<synchronous>, transform_indices = @transform_4, window_bounds = array<i64: 4, 8>}, {pipeline_mode = #tpu.pipeline_mode<synchronous>, transform_indices = @transform_5, window_bounds = array<i64: 4, 1>}, {transform_indices = @transform_6, window_bounds = array<i64: 1, 4, 128>}]} {
    %c0 = arith.constant 0 : index
    %c0_0 = arith.constant 0 : index
    %c0_1 = arith.constant 0 : index
    %0 = vector.load %arg1[%c0, %c0_0, %c0_1] : memref<1x1x1024xi32, #tpu.memory_space<vmem>>, vector<1x1x1024xi32>
    %1 = vector.shape_cast %0 : vector<1x1x1024xi32> to vector<1x1024xi32>
    %2 = tpu.iota {dimensions = array<i32: 0>} : vector<32x1024xi32>
    %3 = vector.broadcast %1 : vector<1x1024xi32> to vector<32x1024xi32>
    %4 = arith.cmpi eq, %3, %2 : vector<32x1024xi32>
    %5 = arith.extui %4 : vector<32x1024xi1> to vector<32x1024xi32>
    %6 = arith.sitofp %5 : vector<32x1024xi32> to vector<32x1024xf32>
    %c0_2 = arith.constant 0 : index
    %c0_3 = arith.constant 0 : index
    %7 = vector.load %arg2[%c0_2, %c0_3] : memref<16x32xf32, #tpu.memory_space<vmem>>, vector<16x32xf32>
    %cst = arith.constant dense<0.000000e+00> : vector<16x1024xf32>
    %8 = tpu.matmul %7, %6, %cst {dimension_numbers = #tpu.dot_dimension_numbers<[1], [0], [0], [1], [0, 0, 1, 1], [], []>} : vector<16x32xf32>, vector<32x1024xf32>, vector<16x1024xf32> -> vector<16x1024xf32>
    %9 = tpu.iota {dimensions = array<i32: 1>} : vector<16x1024xi32>
    %c128_i32 = arith.constant 128 : i32
    %10 = vector.broadcast %c128_i32 : i32 to vector<16x1024xi32>
    %11 = arith.cmpi sge, %9, %10 : vector<16x1024xi32>
    %c128_i32_4 = arith.constant 128 : i32
    %12 = tpu.dynamic_rotate %8 by %c128_i32_4 dim 1 : vector<16x1024xf32>, i32 -> vector<16x1024xf32>
    %cst_5 = arith.constant 0.000000e+00 : f32
    %13 = vector.broadcast %cst_5 : f32 to vector<16x1024xf32>
    %14 = arith.select %11, %12, %13 : vector<16x1024xi1>, vector<16x1024xf32>
    %c896_i32 = arith.constant 896 : i32
    %15 = vector.broadcast %c896_i32 : i32 to vector<16x1024xi32>
    %16 = arith.cmpi slt, %9, %15 : vector<16x1024xi32>
    %c896_i32_6 = arith.constant 896 : i32
    %17 = tpu.dynamic_rotate %8 by %c896_i32_6 dim 1 : vector<16x1024xf32>, i32 -> vector<16x1024xf32>
    %cst_7 = arith.constant 0.000000e+00 : f32
    %18 = vector.broadcast %cst_7 : f32 to vector<16x1024xf32>
    %19 = arith.select %16, %17, %18 : vector<16x1024xi1>, vector<16x1024xf32>
    %20 = tpu.concatenate %14, %8, %19 in 0 : vector<16x1024xf32>, vector<16x1024xf32>, vector<16x1024xf32> -> vector<48x1024xf32>
    %c0_8 = arith.constant 0 : index
    %c0_9 = arith.constant 0 : index
    %21 = vector.load %arg3[%c0_8, %c0_9] : memref<8x48xf32, #tpu.memory_space<vmem>>, vector<8x48xf32>
    %cst_10 = arith.constant dense<0.000000e+00> : vector<8x1024xf32>
    %22 = tpu.matmul %21, %20, %cst_10 {dimension_numbers = #tpu.dot_dimension_numbers<[1], [0], [0], [1], [0, 0, 1, 1], [], []>} : vector<8x48xf32>, vector<48x1024xf32>, vector<8x1024xf32> -> vector<8x1024xf32>
    %c0_11 = arith.constant 0 : index
    %c0_12 = arith.constant 0 : index
    %23 = vector.load %arg4[%c0_11, %c0_12] : memref<8x1xf32, #tpu.memory_space<vmem>>, vector<8x1xf32>
    %24 = vector.broadcast %23 : vector<8x1xf32> to vector<8x1024xf32>
    %25 = arith.addf %22, %24 : vector<8x1024xf32>
    %26 = math.tanh %25 : vector<8x1024xf32>
    %c512_i32 = arith.constant 512 : i32
    %27 = tpu.dynamic_rotate %26 by %c512_i32 dim 1 : vector<8x1024xf32>, i32 -> vector<8x1024xf32>
    %28 = arith.maximumf %26, %27 : vector<8x1024xf32>
    %c768_i32 = arith.constant 768 : i32
    %29 = tpu.dynamic_rotate %28 by %c768_i32 dim 1 : vector<8x1024xf32>, i32 -> vector<8x1024xf32>
    %30 = arith.maximumf %28, %29 : vector<8x1024xf32>
    %c896_i32_13 = arith.constant 896 : i32
    %31 = tpu.dynamic_rotate %30 by %c896_i32_13 dim 1 : vector<8x1024xf32>, i32 -> vector<8x1024xf32>
    %32 = arith.maximumf %30, %31 : vector<8x1024xf32>
    %33 = vector.extract_strided_slice %32 {offsets = [0, 0], sizes = [8, 128], strides = [1, 1]} : vector<8x1024xf32> to vector<8x128xf32>
    %c0_14 = arith.constant 0 : index
    %c0_15 = arith.constant 0 : index
    %34 = vector.load %arg5[%c0_14, %c0_15] : memref<4x8xf32, #tpu.memory_space<vmem>>, vector<4x8xf32>
    %cst_16 = arith.constant dense<0.000000e+00> : vector<4x128xf32>
    %35 = tpu.matmul %34, %33, %cst_16 {dimension_numbers = #tpu.dot_dimension_numbers<[1], [0], [0], [1], [0, 0, 1, 1], [], []>} : vector<4x8xf32>, vector<8x128xf32>, vector<4x128xf32> -> vector<4x128xf32>
    %c0_17 = arith.constant 0 : index
    %c0_18 = arith.constant 0 : index
    %36 = vector.load %arg6[%c0_17, %c0_18] : memref<4x1xf32, #tpu.memory_space<vmem>>, vector<4x1xf32>
    %37 = vector.broadcast %36 : vector<4x1xf32> to vector<4x128xf32>
    %38 = arith.addf %35, %37 : vector<4x128xf32>
    %c0_19 = arith.constant 0 : index
    %c0_20 = arith.constant 0 : index
    %c0_21 = arith.constant 0 : index
    %39 = vector.load %arg7[%c0_19, %c0_20, %c0_21] : memref<1x4x128xf32, #tpu.memory_space<vmem>>, vector<1x4x128xf32>
    %40 = vector.shape_cast %39 : vector<1x4x128xf32> to vector<4x128xf32>
    %41 = vector.shape_cast %38 : vector<4x128xf32> to vector<1x4x128xf32>
    tpu.vector_store %arg7[%c0_19, %c0_20, %c0_21], %41 {strides = array<i32>} : memref<1x4x128xf32, #tpu.memory_space<vmem>>, vector<1x4x128xf32>,
    return
  }
  func.func @transform_0(%arg0: i32) -> (i32, i32, i32) {
    %c0_i32 = arith.constant 0 : i32
    %c0_i32_0 = arith.constant 0 : i32
    %c0_i32_1 = arith.constant 0 : i32
    return %arg0, %c0_i32, %c0_i32_0 : i32, i32, i32
  }
  func.func @transform_1(%arg0: i32) -> (i32, i32) {
    %c0_i32 = arith.constant 0 : i32
    %c0_i32_0 = arith.constant 0 : i32
    %c0_i32_1 = arith.constant 0 : i32
    return %c0_i32, %c0_i32_0 : i32, i32
  }
  func.func @transform_2(%arg0: i32) -> (i32, i32) {
    %c0_i32 = arith.constant 0 : i32
    %c0_i32_0 = arith.constant 0 : i32
    %c0_i32_1 = arith.constant 0 : i32
    return %c0_i32, %c0_i32_0 : i32, i32
  }
  func.func @transform_3(%arg0: i32) -> (i32, i32) {
    %c0_i32 = arith.constant 0 : i32
    %c0_i32_0 = arith.constant 0 : i32
    %c0_i32_1 = arith.constant 0 : i32
    return %c0_i32, %c0_i32_0 : i32, i32
  }
  func.func @transform_4(%arg0: i32) -> (i32, i32) {
    %c0_i32 = arith.constant 0 : i32
    %c0_i32_0 = arith.constant 0 : i32
    %c0_i32_1 = arith.constant 0 : i32
    return %c0_i32, %c0_i32_0 : i32, i32
  }
  func.func @transform_5(%arg0: i32) -> (i32, i32) {
    %c0_i32 = arith.constant 0 : i32
    %c0_i32_0 = arith.constant 0 : i32
    %c0_i32_1 = arith.constant 0 : i32
    return %c0_i32, %c0_i32_0 : i32, i32
  }
  func.func @transform_6(%arg0: i32) -> (i32, i32, i32) {
    %c0_i32 = arith.constant 0 : i32
    %c0_i32_0 = arith.constant 0 : i32
    %c0_i32_1 = arith.constant 0 : i32
    return %arg0, %c0_i32, %c0_i32_0 : i32, i32, i32
  }
}

</mosaic_0001>

<bundles_post_ra>
// kernel: mycnn_forward.1
= control target key start
LH: loop header
LB: loop body
LE: loop exit
PB: predicated region body
PF: predicated region fallthrough
CT: control target
= control target key end

     0   :  { %s1926_s0 = inlined_call_operand.hbm [shape: s32[2,1,1024], index: 0, kind: input, shape index: {}]   ;;  %s1927_s1 = inlined_call_operand.vmem [shape: f32[16,32], index: 1, kind: input, shape index: {}]   ;;  %s1928_s2 = inlined_call_operand.hbm [shape: f32[8,48], index: 2, kind: input, shape index: {}]   ;;  %s1929_s3 = inlined_call_operand.vmem [shape: f32[8,1], index: 3, kind: input, shape index: {}]   ;;  %s1930_s4 = inlined_call_operand.vmem [shape: f32[4,8], index: 4, kind: input, shape index: {}]   ;;  %s1931_s5 = inlined_call_operand.vmem [shape: f32[4,1], index: 5, kind: input, shape index: {}]   ;;  %s1932_s6 = inlined_call_operand.hbm [shape: f32[2,4,128], index: 6, kind: output, shape index: {}]  }
   0x1   :  { %1937 = sst [smem:[#allocation11_spill]] %s1928_s2 }
   0x2   :  { %11 = vsyncpa [#allocation3], 0 }
   0x3   :  { %13 = vsyncpa [#allocation3 + $0x1], 0 }
   0x4   :  { %14 = vsyncpa [#allocation6], 0 }
   0x5   :  { %15 = vsyncpa [#allocation4], 0 }
   0x6   :  { %17 = vsyncpa [#allocation4 + $0x1], 0  ;;  %s1619_s21 = smov 0   ;;  %s1621_s22 = smov 0  }
   0x7   :  { %s1623_s23 = smov 0   ;;  %s1625_s24 = smov 0  }
   0x8 LB: > { %s1640_s25 = sadd.s32 4294967295, %s1575_s24   ;;  %s1275_s26 = sadd.s32 4294967294, %s1575_s24   ;;  %s1575_s24 = sphi %s1625_s24, %s1957_s24   ;;  %s1571_s23 = sphi %s1623_s23, %s1956_s23   ;;  %s1567_s22 = sphi %s1621_s22, %s1955_s22   ;;  %s1563_s21 = sphi %s1619_s21, %s1954_s21  }
   0x9   : > { %p43_p0 = scmp.ne.s32.totalorder %s1567_s22, %s1563_s21  ;;  %p1933_p1 = scmp.eq.s32.totalorder %s1640_s25, 0 }
   0xa   : > { %p178_p3 = scmp.eq.s32.totalorder %s1275_s26, 1  ;;  %p1276_p5 = scmp.ge.s32.totalorder %s1575_s24, 1 }
   0xb   : > { %p1649_p4 = por %p1933_p1, %p43_p0  ;;  %p185_p7 = scmp.lt.s32.totalorder %s1575_s24, 3 }
   0xc   : > { %p1654_p6 = por %p178_p3, %p43_p0  ;;  %s1577_s30 = smov [#allocation5]  }
   0xd   : > { %s1938_s27 = scalar_select %p1649_p4, 1, 0 }
   0xe   : > { %s1939_s28 = scalar_select %p1654_p6, 1, 0 }
   0xf   : > { %p1659_p8 = pnand %p1276_p5, %p185_p7  ;;  %s201_s7 = sshll.u32 %s1577_s30, 4  ;;  %s202_s7 = int_to_ptr.vmem [resolvable:$true] %s201_s7 }
  0x10   : > { %s1667_s8 = sadd.s32 1, %s1575_s24   ;;  %s30_s12 = sadd.s32 1, %s1571_s23 }
  0x11   : > { %s1940_s29 = scalar_select %p1659_p8, 1, 0 }
  0x12   : > { %p1383_p10 = pneg %p1659_p8  ;;  %s27_s10 = ssub.s32 %s1575_s24, %s1667_s8 }
  0x13   : > { %p1677_p12 = scmp.eq.s32.totalorder %s27_s10, 0  ;;  %p37_p13 = scmp.ne.s32.totalorder %s1571_s23, %s1567_s22 }
  0x14   : > { %p1671_p11 = pnand %p1383_p10, %p1933_p1  ;;  %s1464_s13 = scalar_lea.vmem %s202_s7, 128 }
  0x15   : > { %p1465_p3 = scmp.ne.s32.totalorder %s202_s7, %s1464_s13  ;;  %p1472_p9 = scmp.lt.s32.totalorder %s202_s7, %s202_s7 }
  0x16   : > { %p1455_p0 = pneg %p1671_p11  ;;  %p1473_p2 = scmp.lt.s32.totalorder %s1464_s13, %s1464_s13 }
  0x18   : > { %p1467_p5 = pnand %p1465_p3, %p1455_p0  ;;  %p1474_p10 = por %p1473_p2, %p1472_p9 }
  0x1a   : > { %p1468_p7 = pneg %p1467_p5 }
  0x1c   : > { %p1475_p1 = pnand %p1474_p10, %p1468_p7 }
  0x1e   : > { %1478 = shalt.err (!%p1475_p1)
}
  0x1f   : > { %s1943_s2 = sld [smem:[#allocation11_spill]]  ;;  %p38_p1 = scmp.eq.s32.totalorder %s1575_s24, 0 }
  0x20   : > { %s1694_s16 = scalar_select %p1677_p12, %s1571_s23, %s30_s12  }
  0x21   : > { %p1944_p2 = scmp.eq.s32.totalorder %s1640_s25, 1  ;;  %p1396_p0 = scmp.lt.s32.totalorder %s1575_s24, 2 }
  0x22   : > { %s221_s18 = sand.u32 1, %s1571_s23   ;;  %p39_p3 = por %p38_p1, %p37_p13 }
  0x23   : > { %p1702_p9 = por %p1944_p2, %p37_p13  ;;  %s1279_s19 = sshll.u32 %s221_s18, 3 }
  0x24   : > { %s1367_s20 = sshll.u32 %s1575_s24, 7  ;;  %s225_s9 = scalar_lea.vmem [#allocation2], %s1279_s19 }
  0x25   : > { %1386 = dma.hbm_to_vmem [thread:$0]  (!%p1671_p11), %s1943_s2, 128, %s202_s7, [#allocation6]  }
  0x26   : > { %s1945_s17 = scalar_select %p1702_p9, 1, 0 }
  0x27   : > { %s1715_s7 = scalar_lea.hbm %s1926_s0, %s1367_s20  ;;  %s233_s10 = sshll.u32 %s225_s9, 4  ;;  %s234_s10 = int_to_ptr.vmem [resolvable:$true] %s233_s10 }
  0x28   : > { %p1717_p11 = pnand %p1396_p0, %p39_p3  ;;  %s222_s12 = scalar_lea.sflag [#allocation3], %s221_s18 }
  0x29   : > { %s1479_s13 = scalar_lea.hbm %s1715_s7, 128  ;;  %s1484_s20 = scalar_lea.hbm %s1926_s0, 256 }
  0x2a   : > { %p1480_p12 = scmp.ne.s32.totalorder %s1715_s7, %s1479_s13  ;;  %p1481_p13 = pneg %p1717_p11 }
  0x2b   : > { %p1485_p10 = scmp.lt.s32.totalorder %s1715_s7, %s1926_s0  ;;  %p1486_p1 = scmp.lt.s32.totalorder %s1484_s20, %s1479_s13 }
  0x2c   : > { %p1482_p5 = pnand %p1481_p13, %p1480_p12 }
  0x2d   : > { %p1487_p2 = por %p1486_p1, %p1485_p10 }
  0x2e   : > { %p1483_p7 = pneg %p1482_p5 }
  0x30   : > { %p1488_p0 = pnand %p1487_p2, %p1483_p7 }
  0x32   : > { %1491 = shalt.err (!%p1488_p0)
}
  0x33   : > { %s1492_s30 = scalar_lea.vmem %s234_s10, 128  ;;  %s1578_s18 = smov [#allocation2]  }
  0x34   : > { %p1493_p3 = scmp.ne.s32.totalorder %s234_s10, %s1492_s30  ;;  %s1497_s9 = sshll.u32 %s1578_s18, 4  ;;  %s1498_s9 = int_to_ptr.vmem [resolvable:$false] %s1497_s9 }
  0x35   : > { %s1499_s2 = scalar_lea.vmem %s1498_s9, 256  ;;  %p1500_p12 = scmp.lt.s32.totalorder %s234_s10, %s1498_s9 }
  0x36   : > { %p1495_p6 = pnand %p1493_p3, %p1481_p13  ;;  %p1501_p5 = scmp.lt.s32.totalorder %s1499_s2, %s1492_s30 }
  0x38   : > { %p1496_p9 = pneg %p1495_p6  ;;  %p1502_p4 = por %p1501_p5, %p1500_p12 }
  0x3a   : > { %p1503_p8 = pnand %p1502_p4, %p1496_p9 }
  0x3c   : > { %1506 = shalt.err (!%p1503_p8)
}
  0x3d   : > { %1390 = dma.hbm_to_vmem [thread:$0]  (!%p1717_p11), %s1715_s7, 128, %s234_s10, %s222_s12  }
  0x3e   : > { %p1947_p7 = scmp.ne.s32.totalorder %s1940_s29, 0 }
  0x3f   : > { %s1738_s13 = sand.u32 (!%p1947_p7), 1, %s1567_s22   ;;  %p1948_p6 = scmp.ne.s32.totalorder (!%p1947_p7), %s1938_s27, 0 }
  0x40   : > { %242 = sbr.rel (%p1947_p7) target bundleno = 747 (0x2eb), region = 44  ;;  %s1283_s14 = sshll.u32 (!%p1947_p7), %s1738_s13, 3 }
  0x41   : > { %s245_s15 = scalar_lea.sflag (!%p1947_p7), [#allocation3], %s1738_s13  ;;  %s248_s20 = scalar_lea.vmem (!%p1947_p7), [#allocation2], %s1283_s14 }
  0x45   : > { %1550 = dma.done.wait (%p1948_p6), %s245_s15, 128  }
  0x46   : > { %1552 = vsyncadd (%p1948_p6), %s245_s15, 4294967168  ;;  %p1949_p4 = scmp.eq.s32.totalorder %s1640_s25, 0 }
  0x48   : > { %1554 = dma.done.wait (%p1949_p4), [#allocation6], 128   ;;  %p1950_p8 = pmov %p1949_p4 }
  0x49   : > { %v282_v0 = vlaneseq  ;;  %v1579_v1 = vmov 0.0   ;;  %v281_v10 = vld [vmem:[%s248_s20] sm:$0xff]  ;;  %v1580_v18 = vmov 1.0   ;;  %v1581_v27 = vmov 0   ;;  %v789_v41 = vld [vmem:[#allocation5] sm:$0xff]  ;;  %s1285_s18 = sshll.u32 %s1738_s13, 2 }
  0x4a   : > { %1556 = vsyncadd (%p1950_p8), [#allocation6], 4294967168  ;;  %488 = vmatprep.mubr.f32.mxu0 %v1579_v1  ;;  %565 = vmatprep.mubr.f32.mxu1 %v1579_v1  ;;  %v415_v22 = vld [vmem:[%s1927_s1] sm:$0xff]  ;;  %v416_v25 = vld [vmem:[%s1927_s1 + $0x8] sm:$0xff]  ;;  %s1364_s9 = sshll.u32 %s1640_s25, 6  ;;  %s280_s14 = scalar_lea.vmem [#allocation7], %s1285_s18 }
  0x4b   : > { %v1752_v2 = vshrl.u32 %v282_v0, 7  ;;  %v790_v26 = vld [vmem:[%s1929_s3] sm:$0xff]  ;;  %1436 = vset.pattern.permute.xlu0 %v1581_v27  ;;  %s1195_s15 = sshll.u32 %s280_s14, 4  ;;  %s1889_s27 = scalar_lea.hbm %s1932_s6, %s1364_s9  ;;  %s1196_s15 = int_to_ptr.vmem [resolvable:$true] %s1195_s15 }
  0x4c   : > { %793 = vperm.xlu0 %1436, %v790_v26   ;;  %v1100_v28 = vld [vmem:[%s1931_s5] sm:$0xf]  ;;  %s1182_s29 = scalar_lea.sflag [#allocation4], %s1738_s13  ;;  %s1507_s7 = scalar_lea.vmem %s1196_s15, 64 }
  0x4d   : > { %v293_v3 = vsub.s32 1, %v1752_v2  ;;  %v289_v4 = vsub.s32 0, %v1752_v2  ;;  %v301_v5 = vsub.s32 3, %v1752_v2  ;;  %v297_v6 = vsub.s32 2, %v1752_v2  ;;  %p1508_p9 = scmp.ne.s32.totalorder %s1196_s15, %s1507_s7  ;;  %p1951_p11 = scmp.ne.s32.totalorder %s1945_s17, 0 }
  0x4e   : > { %v309_v7 = vsub.s32 5, %v1752_v2  ;;  %v1760_v8 = vadd.s32 24, %v1752_v2  ;;  %v1763_v9 = vadd.s32 16, %v1752_v2  ;;  %v1766_v11 = vadd.s32 8, %v1752_v2  ;;  %s1583_s25 = smov [#allocation7]  }
  0x4f   : > { %v305_v12 = vsub.s32 4, %v1752_v2  ;;  %v294_v13 = vrot.slane %v281_v10, %v293_v3  ;;  %v290_v14 = vrot.slane %v281_v10, %v289_v4  ;;  %v302_v15 = vrot.slane %v281_v10, %v301_v5  ;;  %p1509_p13 = pnand %p1508_p9, %p1951_p11  ;;  %s1511_s10 = sshll.u32 %s1583_s25, 4  ;;  %s1512_s10 = int_to_ptr.vmem [resolvable:$false] %s1511_s10 }
  0x50   : > { %v298_v16 = vrot.slane %v281_v10, %v297_v6  ;;  %v1769_v17 = vrot.slane %v281_v10, %v309_v7  ;;  %v317_v20 = vsub.s32 7, %v1752_v2  ;;  %v313_v21 = vsub.s32 6, %v1752_v2  ;;  %1103 = vperm.xlu0 %1436, %v1100_v28   ;;  %s1513_s11 = scalar_lea.vmem %s1512_s10, 128  ;;  %p1514_p1 = scmp.lt.s32.totalorder %s1196_s15, %s1512_s10 }
  0x51   : > { %vm344_vm0 = vcmp.eq.s32.totalorder %v294_v13, %v1760_v8  ;;  %vm343_vm1 = vcmp.eq.s32.totalorder %v290_v14, %v1760_v8  ;;  %vm346_vm2 = vcmp.eq.s32.totalorder %v302_v15, %v1760_v8  ;;  %vm336_vm3 = vcmp.eq.s32.totalorder %v294_v13, %v1763_v9  ;;  %p1510_p10 = pneg %p1509_p13  ;;  %p1515_p2 = scmp.lt.s32.totalorder %s1513_s11, %s1507_s7 }
  0x52   : > { %1318 = vmatprep.subr.msk.mxu0 %vm344_vm0, %v1580_v18  ;;  %1328 = vmatprep.subr.msk.mxu1 %vm346_vm2, %v1580_v18  ;;  %vm345_vm4 = vcmp.eq.s32.totalorder %v298_v16, %v1760_v8  ;;  %vm335_vm5 = vcmp.eq.s32.totalorder %v290_v14, %v1763_v9  ;;  %vm338_vm6 = vcmp.eq.s32.totalorder %v302_v15, %v1763_v9  ;;  %vm417_vm0 = vcmask 261120  }
  0x53   : > { %1319 = vmatpush1.msk.msra.mxu0 %vm343_vm1, %v1580_v18  ;;  %1329 = vmatpush1.msk.msra.mxu1 %vm345_vm4, %v1580_v18  ;;  %vm328_vm7 = vcmp.eq.s32.totalorder %v294_v13, %v1766_v11  ;;  %vm337_vm8 = vcmp.eq.s32.totalorder %v298_v16, %v1763_v9  ;;  %v306_v19 = vrot.slane %v281_v10, %v305_v12  ;;  %p1516_p0 = por %p1515_p2, %p1514_p1 }
  0x54   : > { %1320 = vmatprep.subr.msk.mxu0 %vm336_vm3, %v1580_v18  ;;  %1330 = vmatprep.subr.msk.mxu1 %vm338_vm6, %v1580_v18  ;;  %vm327_vm9 = vcmp.eq.s32.totalorder %v290_v14, %v1766_v11  ;;  %vm330_vm10 = vcmp.eq.s32.totalorder %v302_v15, %v1766_v11  ;;  %vm329_vm11 = vcmp.eq.s32.totalorder %v298_v16, %v1766_v11 }
  0x55   : > { %1321 = vmatpush1.msk.msra.mxu0 %vm335_vm5, %v1580_v18  ;;  %1331 = vmatpush1.msk.msra.mxu1 %vm337_vm8, %v1580_v18  ;;  %vm320_vm12 = vcmp.eq.s32.totalorder %v294_v13, %v1752_v2  ;;  %vm322_vm13 = vcmp.eq.s32.totalorder %v302_v15, %v1752_v2  ;;  %vm319_vm14 = vcmp.eq.s32.totalorder %v290_v14, %v1752_v2  ;;  %v1099_v14 = vld [vmem:[%s1930_s4] sm:$0xf]  ;;  %p1517_p3 = pnand %p1516_p0, %p1510_p10 }
  0x56   : > { %1322 = vmatprep.subr.msk.mxu0 %vm328_vm7, %v1580_v18  ;;  %1332 = vmatprep.subr.msk.mxu1 %vm330_vm10, %v1580_v18  ;;  %vm321_vm15 = vcmp.eq.s32.totalorder %v298_v16, %v1752_v2  ;;  %vm348_vm1 = vcmp.eq.s32.totalorder %v1769_v17, %v1760_v8  ;;  %vm347_vm2 = vcmp.eq.s32.totalorder %v306_v19, %v1760_v8 }
  0x57   : > { %1323 = vmatpush1.msk.msra.mxu0 %vm327_vm9, %v1580_v18  ;;  %1333 = vmatpush1.msk.msra.mxu1 %vm329_vm11, %v1580_v18  ;;  %vm340_vm3 = vcmp.eq.s32.totalorder %v1769_v17, %v1763_v9  ;;  %v318_v23 = vrot.slane %v281_v10, %v317_v20  ;;  %vm339_vm4 = vcmp.eq.s32.totalorder %v306_v19, %v1763_v9 }
  0x58   : > { %1324 = vmatprep.subr.msk.mxu0 %vm320_vm12, %v1580_v18  ;;  %1334 = vmatprep.subr.msk.mxu1 %vm322_vm13, %v1580_v18  ;;  %v314_v24 = vrot.slane %v281_v10, %v313_v21  ;;  %vm332_vm5 = vcmp.eq.s32.totalorder %v1769_v17, %v1766_v11  ;;  %vm331_vm6 = vcmp.eq.s32.totalorder %v306_v19, %v1766_v11 }
  0x59   : > { %1325 = vmatpush1.msk.msra.mxu0 %vm319_vm14, %v1580_v18  ;;  %1335 = vmatpush1.msk.msra.mxu1 %vm321_vm15, %v1580_v18  ;;  %vm350_vm7 = vcmp.eq.s32.totalorder %v318_v23, %v1760_v8  ;;  %vm324_vm8 = vcmp.eq.s32.totalorder %v1769_v17, %v1752_v2  ;;  %vm323_vm10 = vcmp.eq.s32.totalorder %v306_v19, %v1752_v2 }
  0x5a   : > { %1326 = vmatmul.mubr.msk.f32.vlgmr.msra.gmra.mxu0 %vm417_vm0, %v415_v22  ;;  %1338 = vmatprep.subr.msk.mxu0 %vm348_vm1, %v1580_v18  ;;  %vm349_vm9 = vcmp.eq.s32.totalorder %v314_v24, %v1760_v8  ;;  %vm342_vm11 = vcmp.eq.s32.totalorder %v318_v23, %v1763_v9  ;;  %vm341_vm12 = vcmp.eq.s32.totalorder %v314_v24, %v1763_v9 }
  0x5b   : > { %1336 = vmatmul.mubr.msk.f32.vlgmr.msra.gmra.mxu1 %vm417_vm0, %v415_v22  ;;  %1339 = vmatpush1.msk.msra.mxu0 %vm347_vm2, %v1580_v18  ;;  %vm334_vm13 = vcmp.eq.s32.totalorder %v318_v23, %v1766_v11  ;;  %vm333_vm14 = vcmp.eq.s32.totalorder %v314_v24, %v1766_v11  ;;  %vm326_vm15 = vcmp.eq.s32.totalorder %v318_v23, %v1752_v2  ;;  %vm1582_vm2 = vmmov 0  }
  0x5c   : > { %1340 = vmatprep.subr.msk.mxu0 %vm340_vm3, %v1580_v18  ;;  %494 = vmatprep.mubr.f32.mxu0 %v1579_v1  ;;  %vm325_vm1 = vcmp.eq.s32.totalorder %v314_v24, %v1752_v2  ;;  %vm1106_vm3 = vcmask 64512  }
  0x5d   : > { %1341 = vmatpush1.msk.msra.mxu0 %vm339_vm4, %v1580_v18  ;;  %571 = vmatprep.mubr.f32.mxu1 %v1579_v1 }
  0x5e   : > { %1327 = vmatmul.mubr.msk.f32.gmra.mxu0 %vm417_vm0, %v416_v25  ;;  %1342 = vmatprep.subr.msk.mxu0 %vm332_vm5, %v1580_v18 }
  0x5f   : > { %1337 = vmatmul.mubr.msk.f32.gmra.mxu1 %vm417_vm0, %v416_v25  ;;  %1343 = vmatpush1.msk.msra.mxu0 %vm331_vm6, %v1580_v18 }
  0x60   : > { %1348 = vmatprep.subr.msk.mxu1 %vm350_vm7, %v1580_v18  ;;  %1344 = vmatprep.subr.msk.mxu0 %vm324_vm8, %v1580_v18 }
  0x61   : > { %1349 = vmatpush1.msk.msra.mxu1 %vm349_vm9, %v1580_v18  ;;  %1345 = vmatpush1.msk.msra.mxu0 %vm323_vm10, %v1580_v18 }
  0x62   : > { %642 = vmatprep.mubr.f32.mxu0 %v1579_v1  ;;  %1350 = vmatprep.subr.msk.mxu1 %vm342_vm11, %v1580_v18 }
  0x63   : > { %1346 = vmatmul.mubr.msk.f32.vlgmr.msra.gmra.mxu0 %vm417_vm0, %v415_v22  ;;  %1351 = vmatpush1.msk.msra.mxu1 %vm341_vm12, %v1580_v18 }
  0x64   : > { %1352 = vmatprep.subr.msk.mxu1 %vm334_vm13, %v1580_v18  ;;  %648 = vmatprep.mubr.f32.mxu0 %v1579_v1 }
  0x65   : > { %1353 = vmatpush1.msk.msra.mxu1 %vm333_vm14, %v1580_v18  ;;  %719 = vmatprep.mubr.f32.mxu1 %v1579_v1 }
  0x66   : > { %1354 = vmatprep.subr.msk.mxu1 %vm326_vm15, %v1580_v18 }
  0x67   : > { %1347 = vmatmul.mubr.msk.f32.gmra.mxu0 %vm417_vm0, %v416_v25  ;;  %1355 = vmatpush1.msk.msra.mxu1 %vm325_vm1, %v1580_v18 }
  0x68   : > { %1356 = vmatmul.mubr.msk.f32.vlgmr.msra.gmra.mxu1 %vm417_vm0, %v415_v22  ;;  %864 = vmatprep.mubr.f32.mxu0 %v1579_v1 }
  0x69   : > { %725 = vmatprep.mubr.f32.mxu1 %v1579_v1 }
  0x6c   : > { %1357 = vmatmul.mubr.msk.f32.gmra.mxu1 %vm417_vm0, %v416_v25  ;;  %vm796_vm0 = vcmask 392192  }
  0x6d   : > { %935 = vmatprep.mubr.f32.mxu1 %v1579_v1 }
  0xc7   : > { %v794_v47 = vpop.permute.xlu0 %793 }
  0xcb   : > { %v1104_v15 = vpop.permute.xlu0 %1103 }
 0x11a   : > { %v490_v29 = vpop.f32.mrf.mxu0 }
 0x11b   : > { %v567_v30 = vpop.f32.mrf.mxu1 }
 0x11c   : > { %v492_v31 = vpop.f32.mrf.mxu0 }
 0x11d   : > { %v569_v32 = vpop.f32.mrf.mxu1 }
 0x11e   : > { %v496_v33 = vpop.f32.mrf.mxu0 }
 0x11f   : > { %v573_v34 = vpop.f32.mrf.mxu1 }
 0x120   : > { %v498_v35 = vpop.f32.mrf.mxu0  ;;  %820 = vmatprep.subr.mxu0 %v573_v34 }
 0x121   : > { %821 = vmatpush1.msra.mxu0 %v498_v35  ;;  %v575_v37 = vpop.f32.mrf.mxu1 }
 0x122   : > { %822 = vmatprep.subr.mxu0 %v567_v30 }
 0x123   : > { %v644_v36 = vpop.f32.mrf.mxu0  ;;  %823 = vmatpush1.msra.mxu0 %v492_v31 }
 0x124   : > { %824 = vmatprep.subr.mxu0 %v498_v35 }
 0x125   : > { %v646_v38 = vpop.f32.mrf.mxu0  ;;  %825 = vmatpush1.msra.mxu0 %v496_v33 }
 0x126   : > { %826 = vmatprep.subr.mxu0 %v492_v31 }
 0x127   : > { %v650_v39 = vpop.f32.mrf.mxu0  ;;  %827 = vmatpush1.msra.mxu0 %v490_v29 }
 0x128   : > { %v721_v40 = vpop.f32.mrf.mxu1  ;;  %891 = vmatprep.subr.mxu1 %v650_v39  ;;  %828 = vmatprep.subr.mxu0 %v496_v33 }
 0x129   : > { %892 = vmatpush1.msra.mxu1 %v575_v37  ;;  %829 = vmatpush1.msra.mxu0 %v1579_v1  ;;  %v652_v44 = vpop.f32.mrf.mxu0 }
 0x12a   : > { %v723_v42 = vpop.f32.mrf.mxu1  ;;  %893 = vmatprep.subr.mxu1 %v644_v36  ;;  %830 = vmatprep.subr.mxu0 %v490_v29 }
 0x12b   : > { %894 = vmatpush1.msra.mxu1 %v569_v32  ;;  %831 = vmatpush1.msra.mxu0 %v1579_v1 }
 0x12c   : > { %v727_v43 = vpop.f32.mrf.mxu1  ;;  %895 = vmatprep.subr.mxu1 %v575_v37  ;;  %1358 = vmatmul.mubr.msk.f32.vlgmr.msra.gmra.mxu0 %vm796_vm0, %v789_v41 }
 0x12d   : > { %896 = vmatpush1.msra.mxu1 %v573_v34  ;;  %962 = vmatprep.subr.mxu0 %v727_v43 }
 0x12e   : > { %897 = vmatprep.subr.mxu1 %v569_v32  ;;  %963 = vmatpush1.msra.mxu0 %v652_v44  ;;  %v729_v45 = vpop.f32.mrf.mxu1 }
 0x12f   : > { %898 = vmatpush1.msra.mxu1 %v567_v30  ;;  %964 = vmatprep.subr.mxu0 %v721_v40 }
 0x130   : > { %899 = vmatprep.subr.mxu1 %v573_v34  ;;  %965 = vmatpush1.msra.mxu0 %v646_v38 }
 0x131   : > { %900 = vmatpush1.msra.mxu1 %v498_v35  ;;  %966 = vmatprep.subr.mxu0 %v652_v44 }
 0x132   : > { %901 = vmatprep.subr.mxu1 %v567_v30  ;;  %967 = vmatpush1.msra.mxu0 %v650_v39 }
 0x133   : > { %902 = vmatpush1.msra.mxu1 %v492_v31  ;;  %968 = vmatprep.subr.mxu0 %v646_v38 }
 0x134   : > { %1359 = vmatmul.mubr.msk.f32.vlgmr.msra.gmra.mxu1 %vm796_vm0, %v789_v41  ;;  %969 = vmatpush1.msra.mxu0 %v644_v36 }
 0x135   : > { %1033 = vmatprep.subr.mxu1 %v1579_v1  ;;  %970 = vmatprep.subr.mxu0 %v650_v39 }
 0x136   : > { %1034 = vmatpush1.msra.mxu1 %v729_v45  ;;  %971 = vmatpush1.msra.mxu0 %v575_v37 }
 0x137   : > { %1035 = vmatprep.subr.mxu1 %v1579_v1  ;;  %972 = vmatprep.subr.mxu0 %v644_v36 }
 0x138   : > { %1036 = vmatpush1.msra.mxu1 %v723_v42  ;;  %973 = vmatpush1.msra.mxu0 %v569_v32 }
 0x139   : > { %1006 = vmatprep.mubr.f32.mxu0 %v1579_v1  ;;  %1037 = vmatprep.subr.mxu1 %v729_v45 }
 0x13a   : > { %1360 = vmatmul.mubr.msk.f32.vlgmr.msra.gmra.mxu0 %vm796_vm0, %v789_v41  ;;  %1038 = vmatpush1.msra.mxu1 %v727_v43 }
 0x13b   : > { %1039 = vmatprep.subr.mxu1 %v723_v42  ;;  %1077 = vmatprep.mubr.f32.mxu1 %v1579_v1 }
 0x13c   : > { %1040 = vmatpush1.msra.mxu1 %v721_v40  ;;  %1370 = vmatprep.subr.mxu0 %v1579_v1 }
 0x13d   : > { %1041 = vmatprep.subr.mxu1 %v727_v43  ;;  %1372 = vmatprep.mubr.msk.f32.mxu0 %vm1582_vm2, %v1579_v1 }
 0x13e   : > { %1042 = vmatpush1.msra.mxu1 %v652_v44 }
 0x13f   : > { %1043 = vmatprep.subr.mxu1 %v721_v40 }
 0x140   : > { %1044 = vmatpush1.msra.mxu1 %v646_v38 }
 0x141   : > { %1361 = vmatmul.mubr.msk.f32.vlgmr.msra.gmra.mxu1 %vm796_vm0, %v789_v41 }
 0x1ec   : > { %v866_v46 = vpop.f32.mrf.mxu0 }
 0x1ed   : > { %v867_v51 = vadd.f32 %v866_v46, %v794_v47 }
 0x1ee   : > { %v868_v48 = vpop.f32.mrf.mxu0 }
 0x1ef   : > { %v869_v52 = vadd.f32 %v868_v48, %v794_v47  ;;  %1437 = vtanh.f32 %v867_v51 }
 0x1f1   : > { %1439 = vtanh.f32 %v869_v52 }
 0x1f4   : > { %v937_v49 = vpop.f32.mrf.mxu1 }
 0x1f5   : > { %v938_v54 = vadd.f32 %v937_v49, %v794_v47 }
 0x1f6   : > { %v939_v55 = vpop.f32.mrf.mxu1 }
 0x1f7   : > { %1441 = vtanh.f32 %v938_v54  ;;  %v940_v58 = vadd.f32 %v939_v55, %v794_v47 }
 0x1fa   : > { %v1008_v50 = vpop.f32.mrf.mxu0 }
 0x1fb   : > { %v1009_v56 = vadd.f32 %v1008_v50, %v794_v47 }
 0x1fc   : > { %v1010_v53 = vpop.f32.mrf.mxu0  ;;  %v1438_v63 = vpop.eup %1437 }
 0x1fd   : > { %v1011_v57 = vadd.f32 %v1010_v53, %v794_v47  ;;  %1443 = vtanh.f32 %v1009_v56 }
 0x1fe   : > { %v1440_v0 = vpop.eup %1439 }
 0x1ff   : > { %1445 = vtanh.f32 %v1011_v57 }
 0x201   : > { %v1079_v59 = vpop.f32.mrf.mxu1 }
 0x202   : > { %v1080_v60 = vadd.f32 %v1079_v59, %v794_v47 }
 0x203   : > { %v1081_v61 = vpop.f32.mrf.mxu1 }
 0x204   : > { %1447 = vtanh.f32 %v1080_v60  ;;  %v1082_v62 = vadd.f32 %v1081_v61, %v794_v47  ;;  %v1442_v1 = vpop.eup %1441 }
 0x205   : > { %1449 = vtanh.f32 %v940_v58 }
 0x206   : > { %1451 = vtanh.f32 %v1082_v62 }
 0x20a   : > { %v1444_v2 = vpop.eup %1443 }
 0x20b   : > { %v1092_v8 = vmax.f32 %v1438_v63, %v1444_v2 }
 0x20c   : > { %v1446_v3 = vpop.eup %1445 }
 0x20d   : > { %v1093_v9 = vmax.f32 %v1440_v0, %v1446_v3 }
 0x211   : > { %v1448_v4 = vpop.eup %1447 }
 0x212   : > { %v1450_v5 = vpop.eup %1449  ;;  %v1094_v6 = vmax.f32 %v1442_v1, %v1448_v4 }
 0x213   : > { %v1452_v7 = vpop.eup %1451 }
 0x214   : > { %v1095_v10 = vmax.f32 %v1450_v5, %v1452_v7  ;;  %v1096_v11 = vmax.f32 %v1092_v8, %v1094_v6 }
 0x216   : > { %v1097_v12 = vmax.f32 %v1093_v9, %v1095_v10 }
 0x218   : > { %v1098_v13 = vmax.f32 %v1096_v11, %v1097_v12 }
 0x21a   : > { %1371 = vmatpush3.msra.mxu0 %v1098_v13 }
 0x21b   : > { %1373 = vmatmul.mubr.msk.f32.vlgmr.msra.gmra.mxu0 %vm1106_vm3, %v1099_v14 }
 0x2db   : > { %v1176_v16 = vpop.f32.mrf.mxu0 }
 0x2dc   : > { %v1177_v17 = vadd.f32 %v1176_v16, %v1104_v15 }
 0x2dd   : > { %v1374_v18 = vpop.f32.mrf.mxu0 }
 0x2de   : > { %1180 = vst [vmem:[%s280_s14] sm:$0xf] %v1177_v17 }
 0x2df   : > { %1520 = shalt.err (!%p1517_p3)
}
 0x2e0   : > { %s1521_s12 = scalar_lea.hbm %s1889_s27, 64  ;;  %s1525_s19 = scalar_lea.hbm %s1932_s6, 128 }
 0x2e1   : > { %p1522_p12 = scmp.ne.s32.totalorder %s1889_s27, %s1521_s12  ;;  %p1526_p6 = scmp.lt.s32.totalorder %s1889_s27, %s1932_s6 }
 0x2e2   : > { %p1527_p4 = scmp.lt.s32.totalorder %s1525_s19, %s1521_s12 }
 0x2e3   : > { %p1523_p5 = pnand %p1522_p12, %p1951_p11 }
 0x2e4   : > { %p1528_p8 = por %p1527_p4, %p1526_p6 }
 0x2e5   : > { %p1524_p7 = pneg %p1523_p5 }
 0x2e7   : > { %p1529_p9 = pnand %p1528_p8, %p1524_p7 }
 0x2e9   : > { %1532 = shalt.err (!%p1529_p9)
}
 0x2ea   : > { %1381 = dma.vmem_to_hbm [thread:$0]  (%p1951_p11), %s1196_s15, 64, %s1889_s27, %s1182_s29  }
 0x2eb PF: > { %s1207_s9 = sand.u32 1, %s1563_s21   ;;  %p1952_p13 = scmp.ne.s32.totalorder %s1939_s28, 0 }
 0x2ec   : > { %p1953_p10 = scmp.ge.s32.totalorder %s1575_s24, 2  ;;  %s1208_s14 = scalar_lea.sflag [#allocation4], %s1207_s9 }
 0x2ee   : > { %p1392_p1 = pnand %p1953_p10, %p1952_p13 }
 0x2f0   : > { %p1393_p2 = pneg %p1392_p1 }
 0x2f2   : > { %1558 = dma.done.wait (%p1393_p2), %s1208_s14, 64  }
 0x2f3   : > { %1560 = vsyncadd (%p1393_p2), %s1208_s14, 4294967232  ;;  %p20_p0 = scmp.ge.s32.totalorder %s1667_s8, 4   ;;  %s1954_s21 = smov %s1567_s22 }
 0x2f4   : > { %s1955_s22 = smov %s1571_s23  ;;  %s1956_s23 = smov %s1694_s16 }
 0x2f5   : > { %s1957_s24 = smov %s1667_s8  ;;  %22 = sbr.rel (!%p20_p0) target bundleno = 8 (0x8), region = 93 }
 0x2fa   :  { %1213 = vsyncpa [#allocation3], 1 }
 0x2fb   :  { %1215 = vsyncpa [#allocation3 + $0x1], 1 }
 0x2fc   :  { %1216 = vsyncpa [#allocation6], 1 }
 0x2fd   :  { %1217 = vsyncpa [#allocation4], 1 }
 0x2fe   :  { %1219 = vsyncpa [#allocation4 + $0x1], 1 }

</bundles_post_ra>
